<compile_context>
chip_gen: v7x
topology: tpu7x:2x2x1
jax: 0.10.0
libtpu: 0.0.40
codegen_flags: <defaults>
</compile_context>

<pallas_src>
from functools import partial

import numpy as np

import jax
import jax.numpy as jnp
from jax.experimental import pallas as pl
from jax.experimental.pallas import tpu as pltpu

_MIB = 1024 * 1024


def predictor_kernel(x_ref, w_ref, b_ref, out_ref):
    # Normalization already folded into w/b: bf16 matmul (MXU, f32 accum)
    # + f32 bias + softmax over the lane-dense padded class dim.
    logits = jnp.dot(x_ref[...], w_ref[...],
                     preferred_element_type=jnp.float32) + b_ref[...]
    # Padded class columns carry bias=-1e30 -> exp()=0 -> zero probability.
    m = jnp.max(logits, axis=1, keepdims=True)
    e = jnp.exp(logits - m)
    denom = jnp.sum(e, axis=1, keepdims=True)
    out_ref[...] = e * pl.reciprocal(denom, approx=True)


def _vmem_limits():
    """(vmem_limit_bytes, tile_budget_bytes) derived from the chip's VMEM."""
    try:
        info = pltpu.get_tpu_info()
        cap = getattr(info, "vmem_capacity_bytes", None) or 64 * _MIB
    except Exception:  # pragma: no cover - conservative fallback
        cap = 64 * _MIB  # v7x-sized default
    # Leave headroom for Mosaic internal scratch; clamp to a safe range.
    limit = int(max(32 * _MIB, min(cap - 8 * _MIB, 100 * _MIB)))
    budget = int(limit * 3 // 4)
    return limit, budget


def _choose_tm(batch8, feat, n_pad, tile_budget):
    """Batch tile: multiple of 8, largest power-of-two step whose full VMEM
    footprint (2x bf16 x tile + resident bf16 weights + bias + 2x f32 out tile)
    fits the budget; capped so >=2 grid steps exist when the batch allows."""

    def footprint(t):
        return (2 * t * feat * 2          # x tiles (bf16), double-buffered
                + 2 * feat * n_pad * 2    # weights (bf16), conservatively 2 bufs
                + 2 * n_pad * 4           # bias (f32)
                + 2 * t * n_pad * 4)      # out tiles (f32), double-buffered

    tm = 8
    while tm * 2 <= min(batch8, 1024) and footprint(tm * 2) <= tile_budget:
        tm *= 2
    if batch8 >= 16:
        # Keep at least 2 grid steps so v7x's second TensorCore gets work.
        tm = min(tm, max(8, (batch8 // 2) // 8 * 8))
    return tm


@partial(jax.jit, static_argnames=("resize", "crop"))
def predictor_forward(x, mean, std, w, b, *, resize=32, crop=16):
    """x: (B, C, H, W) float32 in [0, 1] (NCHW, like the PyTorch module)."""
    B, C, H, W = x.shape

    # ---- glue: T.Resize([resize]) + T.CenterCrop(crop), fused ----
    # torchvision: shorter side -> `resize`, long side -> int(resize*long/short).
    if H <= W:
        new_h, new_w = resize, int(resize * W / H)
    else:
        new_h, new_w = int(resize * H / W), resize
    top = (new_h - crop) // 2
    left = (new_w - crop) // 2
    # scale_and_translate with resize's scale and translation = -(top, left)
    # computes exactly Resize(new_h,new_w)[..., top:top+crop, left:left+crop]
    # without materializing the full resized image (only the crop's columns of
    # the filter weight matrices are ever built).
    # TODO(synk): antialiased bilinear here may differ slightly from
    # torchvision's antialiased bilinear kernel when downscaling.
    scale = np.array([new_h / H, new_w / W], dtype=np.float32)
    translation = np.array([-float(top), -float(left)], dtype=np.float32)
    xc = jax.image.scale_and_translate(
        x.astype(jnp.float32), (B, C, crop, crop), (2, 3),
        scale, translation, method="linear", antialias=True)

    # ---- glue: T.ConvertImageDtype(torch.float) — input already float [0,1] ----
    xc = xc.astype(jnp.float32)

    feat = C * crop * crop
    x_flat = xc.reshape(B, feat)                                   # NCHW flatten (C-major)

    # ---- fold Normalize(mean, std) into the classifier weights/bias ----
    # (x - mean) * invstd @ W + b  ==  x @ (invstd*W) + (b - (mean*invstd) @ W)
    num_classes = w.shape[1]
    mean_flat = jnp.repeat(mean.astype(jnp.float32), crop * crop)          # (feat,)
    invstd_flat = jnp.repeat(1.0 / std.astype(jnp.float32), crop * crop)   # (feat,)
    w_f32 = w.astype(jnp.float32)
    w_folded = invstd_flat[:, None] * w_f32                                # (feat, N)
    b_folded = b.astype(jnp.float32) - (mean_flat * invstd_flat) @ w_f32   # (N,)

    # ---- pad class dim to a lane-dense multiple of 128 (no extra padding) ----
    n_pad = ((num_classes + 127) // 128) * 128
    w_pad = jnp.zeros((feat, n_pad), jnp.float32).at[:, :num_classes].set(w_folded)
    b_pad = jnp.full((1, n_pad), -1e30, jnp.float32).at[0, :num_classes].set(b_folded)

    # ---- bf16 operands for the MXU (f32 accumulation inside the kernel) ----
    x_bf16 = x_flat.astype(jnp.bfloat16)
    w_bf16 = w_pad.astype(jnp.bfloat16)

    # ---- batch tiling: pad to sublane multiple of 8, budget VMEM per chip ----
    vmem_limit, tile_budget = _vmem_limits()
    batch8 = max(8, ((B + 7) // 8) * 8)
    tm = _choose_tm(batch8, feat, n_pad, tile_budget)
    grid_m = (batch8 + tm - 1) // tm
    b_padded = grid_m * tm
    if b_padded != B:
        x_bf16 = jnp.pad(x_bf16, ((0, b_padded - B), (0, 0)))

    cost = pl.CostEstimate(
        flops=2 * b_padded * feat * n_pad,
        transcendentals=b_padded * n_pad,
        bytes_accessed=(b_padded * feat * 2        # x (bf16)
                        + feat * n_pad * 2         # weights (bf16)
                        + n_pad * 4                # bias (f32)
                        + b_padded * n_pad * 4),   # output (f32), written once
    )

    # TODO(synk): on v7x, pipeline_mode=pl.Buffered(1) on the resident weight /
    # bias specs would halve their footprint; left at the default buffering for
    # compatibility (the VMEM budget above already accounts for 2 buffers).
    probs_pad = pl.pallas_call(
        predictor_kernel,
        out_shape=jax.ShapeDtypeStruct((b_padded, n_pad), jnp.float32),
        grid=(grid_m,),
        in_specs=[
            pl.BlockSpec((tm, feat), lambda i: (i, 0)),     # x tile (pipelined, bf16)
            pl.BlockSpec((feat, n_pad), lambda i: (0, 0)),  # weights (resident, bf16)
            pl.BlockSpec((1, n_pad), lambda i: (0, 0)),     # bias (resident, f32)
        ],
        out_specs=pl.BlockSpec((tm, n_pad), lambda i: (i, 0)),
        compiler_params=pltpu.CompilerParams(
            dimension_semantics=("parallel",),
            vmem_limit_bytes=int(vmem_limit)),
        cost_estimate=cost,
    )(x_bf16, w_bf16, b_pad)

    # Drop batch padding and padded (zero-probability) classes.
    return probs_pad[:B, :num_classes]


if __name__ == "__main__":
    key = jax.random.PRNGKey(0)
    k_x, k_w, k_b = jax.random.split(key, 3)

    # Small image-like input (NCHW, float in [0,1]); non-square spatial to
    # exercise the aspect-preserving resize.
    B, C, H, W = 2, 3, 24, 28
    x = jax.random.uniform(k_x, (B, C, H, W), dtype=jnp.float32)

    # Normalization constants (ImageNet-ish, one per channel).
    mean = jnp.array([0.485, 0.456, 0.406], dtype=jnp.float32)
    std = jnp.array([0.229, 0.224, 0.225], dtype=jnp.float32)

    # Synthetic classifier model parameters: features -> num_classes.
    class_names = [f"class_{i}" for i in range(8)]
    num_classes = len(class_names)
    crop = 16
    feat = C * crop * crop
    w_lin = 0.02 * jax.random.normal(k_w, (feat, num_classes), dtype=jnp.float32)
    b_lin = 0.01 * jax.random.normal(k_b, (num_classes,), dtype=jnp.float32)

    probs = predictor_forward(x, mean, std, w_lin, b_lin, resize=32, crop=crop)
    probs = jax.block_until_ready(probs)

    assert probs.shape == (B, num_classes)
    assert bool(jnp.all(jnp.isfinite(probs)))
    # approx reciprocal => rows sum to 1 only to ~1e-3/1e-4.
    assert bool(jnp.allclose(jnp.sum(probs, axis=1), 1.0, atol=1e-2))

    # Pure-JAX (f32) reference: full resize -> center crop -> normalize ->
    # linear -> softmax.  Loose tolerance absorbs bf16 matmul + approx recip.
    rh, rw = (32, int(32 * W / H)) if H <= W else (int(32 * H / W), 32)
    xr = jax.image.resize(x, (B, C, rh, rw), method="bilinear")
    t0, l0 = (rh - crop) // 2, (rw - crop) // 2
    xcr = xr[:, :, t0:t0 + crop, l0:l0 + crop]
    xn = (xcr - mean[None, :, None, None]) / std[None, :, None, None]
    ref_probs = jax.nn.softmax(xn.reshape(B, feat) @ w_lin + b_lin, axis=1)
    assert bool(jnp.allclose(probs, ref_probs, atol=2e-2))

    print("KERNEL_OK")
</pallas_src>

<mosaic_0001>
module attributes {stable_mosaic.version = 11 : i64} {
  func.func @predictor_kernel(%arg0: i32, %arg1: memref<8x768xbf16, #tpu.memory_space<vmem>>, %arg2: memref<768x128xbf16, #tpu.memory_space<vmem>>, %arg3: memref<1x128xf32, #tpu.memory_space<vmem>>, %arg4: memref<8x128xf32, #tpu.memory_space<vmem>>) attributes {dimension_semantics = [#tpu.dimension_semantics<parallel>], iteration_bounds = array<i64: 1>, scalar_prefetch = 0 : i64, scratch_operands = 0 : i64, tpu.core_type = #tpu.core_type<tc>, window_params = [{transform_indices = @transform_0, window_bounds = array<i64: 8, 768>}, {pipeline_mode = #tpu.pipeline_mode<synchronous>, transform_indices = @transform_1, window_bounds = array<i64: 768, 128>}, {pipeline_mode = #tpu.pipeline_mode<synchronous>, transform_indices = @transform_2, window_bounds = array<i64: 1, 128>}, {transform_indices = @transform_3, window_bounds = array<i64: 8, 128>}]} {
    %c0 = arith.constant 0 : index
    %c0_0 = arith.constant 0 : index
    %0 = vector.load %arg1[%c0, %c0_0] : memref<8x768xbf16, #tpu.memory_space<vmem>>, vector<8x768xbf16>
    %c0_1 = arith.constant 0 : index
    %c0_2 = arith.constant 0 : index
    %1 = vector.load %arg2[%c0_1, %c0_2] : memref<768x128xbf16, #tpu.memory_space<vmem>>, vector<768x128xbf16>
    %cst = arith.constant dense<0.000000e+00> : vector<8x128xf32>
    %2 = tpu.matmul %0, %1, %cst {dimension_numbers = #tpu.dot_dimension_numbers<[1], [0], [0], [1], [0, 0, 1, 1], [], []>} : vector<8x768xbf16>, vector<768x128xbf16>, vector<8x128xf32> -> vector<8x128xf32>
    %c0_3 = arith.constant 0 : index
    %c0_4 = arith.constant 0 : index
    %3 = vector.load %arg3[%c0_3, %c0_4] : memref<1x128xf32, #tpu.memory_space<vmem>>, vector<1x128xf32>
    %4 = vector.broadcast %3 : vector<1x128xf32> to vector<8x128xf32>
    %5 = arith.addf %2, %4 : vector<8x128xf32>
    %cst_5 = arith.constant dense<0xFF800000> : vector<8xf32>
    %6 = vector.multi_reduction <maximumf>, %5, %cst_5 [1] : vector<8x128xf32> to vector<8xf32>
    %7 = vector.shape_cast %6 : vector<8xf32> to vector<8x1xf32>
    %8 = vector.broadcast %7 : vector<8x1xf32> to vector<8x128xf32>
    %9 = arith.subf %5, %8 : vector<8x128xf32>
    %10 = math.exp %9 : vector<8x128xf32>
    %cst_6 = arith.constant dense<0.000000e+00> : vector<8xf32>
    %11 = vector.multi_reduction <add>, %10, %cst_6 [1] : vector<8x128xf32> to vector<8xf32>
    %12 = vector.shape_cast %11 : vector<8xf32> to vector<8x1xf32>
    %13 = tpu.reciprocal %12 {approx = true} : vector<8x1xf32> -> vector<8x1xf32>
    %14 = vector.broadcast %13 : vector<8x1xf32> to vector<8x128xf32>
    %15 = arith.mulf %10, %14 : vector<8x128xf32>
    %c0_7 = arith.constant 0 : index
    %c0_8 = arith.constant 0 : index
    %16 = vector.load %arg4[%c0_7, %c0_8] : memref<8x128xf32, #tpu.memory_space<vmem>>, vector<8x128xf32>
    tpu.vector_store %arg4[%c0_7, %c0_8], %15 {strides = array<i32>} : memref<8x128xf32, #tpu.memory_space<vmem>>, vector<8x128xf32>,
    return
  }
  func.func @transform_0(%arg0: i32) -> (i32, i32) {
    %c0_i32 = arith.constant 0 : i32
    %c0_i32_0 = arith.constant 0 : i32
    return %arg0, %c0_i32 : i32, i32
  }
  func.func @transform_1(%arg0: i32) -> (i32, i32) {
    %c0_i32 = arith.constant 0 : i32
    %c0_i32_0 = arith.constant 0 : i32
    %c0_i32_1 = arith.constant 0 : i32
    return %c0_i32, %c0_i32_0 : i32, i32
  }
  func.func @transform_2(%arg0: i32) -> (i32, i32) {
    %c0_i32 = arith.constant 0 : i32
    %c0_i32_0 = arith.constant 0 : i32
    %c0_i32_1 = arith.constant 0 : i32
    return %c0_i32, %c0_i32_0 : i32, i32
  }
  func.func @transform_3(%arg0: i32) -> (i32, i32) {
    %c0_i32 = arith.constant 0 : i32
    %c0_i32_0 = arith.constant 0 : i32
    return %arg0, %c0_i32 : i32, i32
  }
}

</mosaic_0001>

<bundles_post_ra>
// kernel: mul.10
= control target key start
LH: loop header
LB: loop body
LE: loop exit
PB: predicated region body
PF: predicated region fallthrough
CT: control target
= control target key end

     0   :  { %s40_s0 = inlined_call_operand.vmem [shape: f32[3,256], index: 0, kind: input, shape index: {}]   ;;  %s41_s1 = inlined_call_operand.vmem [shape: f32[768], index: 1, kind: output, shape index: {}]  }
   0x1   :  { %v16_v0 = vld [vmem:[%s40_s0 + $0x4] sm:$0xf]  ;;  %v8_v1 = vld [vmem:[%s40_s0] sm:$0xf] }
   0x2   :  { %7 = vst [vmem:[#allocation0 + $0x8] sm:$0xf] %v16_v0  ;;  %9 = vst [vmem:[#allocation0] sm:$0xf] %v8_v1 }
   0x9   :  { %v10_v2 = vld [vmem:[#allocation0] sm:$0x7]   ;;  %v13_v3 = vld [vmem:[#allocation0 + $0x8] sm:$0x7]  }
   0xa   :  { %11 = vst [vmem:[%s41_s1] ss:$2 sm:$0x7] %v10_v2   ;;  %17 = vst [vmem:[%s41_s1 + $0x1] ss:$2 sm:$0x7] %v13_v3  }

// kernel: mul.13
= control target key start
LH: loop header
LB: loop body
LE: loop exit
PB: predicated region body
PF: predicated region fallthrough
CT: control target
= control target key end

     0   :  { %s34_s0 = inlined_call_operand.vmem [shape: f32[768], index: 0, kind: input, shape index: {}]   ;;  %s35_s1 = inlined_call_operand.vmem [shape: f32[768], index: 1, kind: input, shape index: {}]   ;;  %s36_s2 = inlined_call_operand.vmem [shape: f32[768], index: 2, kind: output, shape index: {}]  }
   0x1   :  { %v3_v0 = vld [vmem:[%s34_s0] sm:$0x3f] }
   0x2   :  { %v4_v1 = vld [vmem:[%s35_s1] sm:$0x3f] }
   0x3   :  { %v7_v2 = vmul.f32 %v4_v1, %v3_v0 }
   0x5   :  { %9 = vst [vmem:[%s36_s2] sm:$0xff] %v7_v2 }

// kernel: predictor_forward.1
= control target key start
LH: loop header
LB: loop body
LE: loop exit
PB: predicated region body
PF: predicated region fallthrough
CT: control target
= control target key end

     0   :  { %s922_s1 = inlined_call_operand.vmem [shape: bf16[768,128], index: 1, kind: input, shape index: {}]   ;;  %s923_s0 = inlined_call_operand.vmem [shape: bf16[8,768], index: 0, kind: input, shape index: {}]   ;;  %s924_s2 = inlined_call_operand.vmem [shape: f32[1,128], index: 2, kind: input, shape index: {}]   ;;  %s925_s3 = inlined_call_operand.vmem [shape: f32[8,128], index: 3, kind: output, shape index: {}]  }
   0x1   :  { %v685_v0 = vld [vmem:[%s922_s1 + $0x40] sm:$0xff]   ;;  %v689_v4 = vld [vmem:[%s922_s1 + $0x48] sm:$0xff]   ;;  %v693_v8 = vld [vmem:[%s922_s1 + $0x50] sm:$0xff]  }
   0x2   :  { %v686_v1 = vld [vmem:[%s922_s1] sm:$0xff]   ;;  %619 = vmatprep.subr.bf16.mxu0 %v685_v0  ;;  %v690_v5 = vld [vmem:[%s922_s1 + $0x8] sm:$0xff]   ;;  %v694_v9 = vld [vmem:[%s922_s1 + $0x10] sm:$0xff]  }
   0x3   :  { %v687_v2 = vld [vmem:[%s922_s1 + $0xc0] sm:$0xff]   ;;  %620 = vmatpush3.bf16.msra.mxu0 %v686_v1  ;;  %v691_v6 = vld [vmem:[%s922_s1 + $0xc8] sm:$0xff]   ;;  %v695_v10 = vld [vmem:[%s922_s1 + $0xd0] sm:$0xff]  }
   0x4   :  { %v688_v3 = vld [vmem:[%s922_s1 + $0x80] sm:$0xff]   ;;  %641 = vmatprep.subr.bf16.mxu1 %v687_v2  ;;  %621 = vmatprep.subr.bf16.mxu0 %v689_v4  ;;  %v692_v7 = vld [vmem:[%s922_s1 + $0x88] sm:$0xff]   ;;  %v696_v11 = vld [vmem:[%s922_s1 + $0x90] sm:$0xff]  }
   0x5   :  { %642 = vmatpush3.bf16.msra.mxu1 %v688_v3  ;;  %v697_v12 = vld [vmem:[%s922_s1 + $0x58] sm:$0xff]   ;;  %v701_v16 = vld [vmem:[%s922_s1 + $0x60] sm:$0xff]   ;;  %v705_v20 = vld [vmem:[%s922_s1 + $0x68] sm:$0xff]  }
   0x6   :  { %643 = vmatprep.subr.bf16.mxu1 %v691_v6  ;;  %v698_v13 = vld [vmem:[%s922_s1 + $0x18] sm:$0xff]   ;;  %v702_v17 = vld [vmem:[%s922_s1 + $0x20] sm:$0xff]   ;;  %v706_v21 = vld [vmem:[%s922_s1 + $0x28] sm:$0xff]  }
   0x7   :  { %622 = vmatpush3.bf16.msra.mxu0 %v690_v5  ;;  %v699_v14 = vld [vmem:[%s922_s1 + $0xd8] sm:$0xff]   ;;  %v703_v18 = vld [vmem:[%s922_s1 + $0xe0] sm:$0xff]   ;;  %v707_v22 = vld [vmem:[%s922_s1 + $0xe8] sm:$0xff]  }
   0x8   :  { %623 = vmatprep.subr.bf16.mxu0 %v693_v8  ;;  %v700_v15 = vld [vmem:[%s922_s1 + $0x98] sm:$0xff]   ;;  %v704_v19 = vld [vmem:[%s922_s1 + $0xa0] sm:$0xff]   ;;  %v708_v23 = vld [vmem:[%s922_s1 + $0xa8] sm:$0xff]  }
   0x9   :  { %644 = vmatpush3.bf16.msra.mxu1 %v692_v7  ;;  %v709_v24 = vld [vmem:[%s922_s1 + $0x70] sm:$0xff]   ;;  %v713_v28 = vld [vmem:[%s922_s1 + $0x78] sm:$0xff]   ;;  %v15_v31 = vld [vmem:[%s923_s0] sm:$0xff] }
   0xa   :  { %645 = vmatprep.subr.bf16.mxu1 %v695_v10  ;;  %v710_v25 = vld [vmem:[%s922_s1 + $0x30] sm:$0xff]   ;;  %v714_v29 = vld [vmem:[%s922_s1 + $0x38] sm:$0xff]   ;;  %v565_v32 = vcombine.low %v15_v31, %v15_v31  ;;  %v566_v33 = vcombine.high %v15_v31, %v15_v31  ;;  %v719_v35 = vld [vmem:[%s922_s1 + $0x140] sm:$0xff]  }
   0xb   :  { %624 = vmatpush3.bf16.msra.mxu0 %v694_v9  ;;  %v711_v26 = vld [vmem:[%s922_s1 + $0xf0] sm:$0xff]   ;;  %v715_v30 = vld [vmem:[%s922_s1 + $0xf8] sm:$0xff]   ;;  %v16_v36 = vld [vmem:[%s923_s0 + $0x8] sm:$0xff] }
   0xc   :  { %625 = vmatprep.subr.bf16.mxu0 %v697_v12  ;;  %v712_v27 = vld [vmem:[%s922_s1 + $0xb0] sm:$0xff]   ;;  %v718_v34 = vld [vmem:[%s922_s1 + $0xb8] sm:$0xff]   ;;  %462 = vmatprep.mubr.bf16.mxu0 %v566_v33  ;;  %v567_v37 = vcombine.low %v16_v36, %v16_v36  ;;  %v568_v38 = vcombine.high %v16_v36, %v16_v36  ;;  %v722_v39 = vld [vmem:[%s922_s1 + $0x100] sm:$0xff]  }
   0xd   :  { %646 = vmatpush3.bf16.msra.mxu1 %v696_v11  ;;  %v723_v40 = vld [vmem:[%s922_s1 + $0x148] sm:$0xff]   ;;  %v725_v42 = vld [vmem:[%s922_s1 + $0x150] sm:$0xff]   ;;  %v727_v44 = vld [vmem:[%s922_s1 + $0x158] sm:$0xff]  }
   0xe   :  { %647 = vmatprep.subr.bf16.mxu1 %v699_v14  ;;  %502 = vmatprep.mubr.bf16.mxu1 %v568_v38  ;;  %v724_v41 = vld [vmem:[%s922_s1 + $0x108] sm:$0xff]   ;;  %v726_v43 = vld [vmem:[%s922_s1 + $0x110] sm:$0xff]   ;;  %v728_v45 = vld [vmem:[%s922_s1 + $0x118] sm:$0xff]  }
   0xf   :  { %626 = vmatpush3.bf16.msra.mxu0 %v698_v13  ;;  %v729_v46 = vld [vmem:[%s922_s1 + $0x160] sm:$0xff]   ;;  %v17_v48 = vld [vmem:[%s923_s0 + $0x10] sm:$0xff]  ;;  %v731_v49 = vld [vmem:[%s922_s1 + $0x168] sm:$0xff]  }
  0x10   :  { %627 = vmatprep.subr.bf16.mxu0 %v701_v16  ;;  %v730_v47 = vld [vmem:[%s922_s1 + $0x120] sm:$0xff]   ;;  %v570_v50 = vcombine.high %v17_v48, %v17_v48  ;;  %v732_v51 = vld [vmem:[%s922_s1 + $0x128] sm:$0xff]   ;;  %v733_v52 = vld [vmem:[%s922_s1 + $0x170] sm:$0xff]   ;;  %v569_v56 = vcombine.low %v17_v48, %v17_v48 }
  0x11   :  { %648 = vmatpush3.bf16.msra.mxu1 %v700_v15  ;;  %v734_v53 = vld [vmem:[%s922_s1 + $0x130] sm:$0xff]   ;;  %v735_v54 = vld [vmem:[%s922_s1 + $0x178] sm:$0xff]   ;;  %v564_v58 = vld [vmem:[%s924_s2] ss:$0 sm:$0xff] }
  0x12   :  { %649 = vmatprep.subr.bf16.mxu1 %v703_v18  ;;  %v736_v55 = vld [vmem:[%s922_s1 + $0x138] sm:$0xff]  }
  0x13   :  { %628 = vmatpush3.bf16.msra.mxu0 %v702_v17 }
  0x14   :  { %629 = vmatprep.subr.bf16.mxu0 %v705_v20 }
  0x15   :  { %650 = vmatpush3.bf16.msra.mxu1 %v704_v19 }
  0x16   :  { %651 = vmatprep.subr.bf16.mxu1 %v707_v22 }
  0x17   :  { %630 = vmatpush3.bf16.msra.mxu0 %v706_v21 }
  0x18   :  { %631 = vmatprep.subr.bf16.mxu0 %v709_v24 }
  0x19   :  { %652 = vmatpush3.bf16.msra.mxu1 %v708_v23 }
  0x1a   :  { %653 = vmatprep.subr.bf16.mxu1 %v711_v26 }
  0x1b   :  { %632 = vmatpush3.bf16.msra.mxu0 %v710_v25 }
  0x1c   :  { %633 = vmatprep.subr.bf16.mxu0 %v713_v28 }
  0x1d   :  { %654 = vmatpush3.bf16.msra.mxu1 %v712_v27 }
  0x1e   :  { %655 = vmatprep.subr.bf16.mxu1 %v715_v30 }
  0x1f   :  { %634 = vmatpush3.bf16.msra.mxu0 %v714_v29 }
  0x20   :  { %663 = vmatprep.subr.bf16.mxu0 %v719_v35 }
  0x21   :  { %656 = vmatpush3.bf16.msra.mxu1 %v718_v34 }
  0x22   :  { %463 = vmatmul.mubr.bf16.vlgmr.msra.gmra.mrb[0].mxu0 %v565_v32 }
  0x23   :  { %664 = vmatpush3.bf16.msra.mxu0 %v722_v39  ;;  %542 = vmatprep.mubr.bf16.mxu0 %v570_v50 }
  0x24   :  { %503 = vmatmul.mubr.bf16.vlgmr.msra.gmra.mrb[0].mxu1 %v567_v37  ;;  %665 = vmatprep.subr.bf16.mxu0 %v723_v40 }
  0x27   :  { %666 = vmatpush3.bf16.msra.mxu0 %v724_v41 }
  0x28   :  { %667 = vmatprep.subr.bf16.mxu0 %v725_v42 }
  0x2b   :  { %668 = vmatpush3.bf16.msra.mxu0 %v726_v43 }
  0x2c   :  { %669 = vmatprep.subr.bf16.mxu0 %v727_v44 }
  0x2f   :  { %670 = vmatpush3.bf16.msra.mxu0 %v728_v45 }
  0x30   :  { %671 = vmatprep.subr.bf16.mxu0 %v729_v46 }
  0x33   :  { %672 = vmatpush3.bf16.msra.mxu0 %v730_v47 }
  0x34   :  { %673 = vmatprep.subr.bf16.mxu0 %v731_v49 }
  0x37   :  { %674 = vmatpush3.bf16.msra.mxu0 %v732_v51 }
  0x38   :  { %675 = vmatprep.subr.bf16.mxu0 %v733_v52 }
  0x3b   :  { %676 = vmatpush3.bf16.msra.mxu0 %v734_v53 }
  0x3c   :  { %677 = vmatprep.subr.bf16.mxu0 %v735_v54 }
  0x3f   :  { %678 = vmatpush3.bf16.msra.mxu0 %v736_v55 }
  0x42   :  { %543 = vmatmul.mubr.bf16.vlgmr.msra.gmra.mrb[4].mxu0 %v569_v56 }
  0xf5   :  { %v635_v57 = vpop.f32.mrb[0].mxu0 }
  0xf6   :  { %v636_v59 = vpop.f32.mrb[1].mxu0 }
  0xf7   :  { %v637_v60 = vadd.f32 %v636_v59, %v635_v57  ;;  %v638_v61 = vpop.f32.mrb[2].mxu0  ;;  %v657_v62 = vpop.f32.mrb[0].mxu1 }
  0xf8   :  { %v639_v63 = vpop.f32.mrb[3].mxu0  ;;  %v658_v0 = vpop.f32.mrb[1].mxu1 }
  0xf9   :  { %v465_v1 = vadd.f32 %v637_v60, %v564_v58  ;;  %v659_v2 = vadd.f32 %v658_v0, %v657_v62  ;;  %v660_v3 = vpop.f32.mrb[2].mxu1 }
  0xfa   :  { %v661_v4 = vpop.f32.mrb[3].mxu1 }
  0xfb   :  { %v505_v5 = vadd.f32 %v659_v2, %v465_v1 }
 0x115   :  { %v679_v6 = vpop.f32.mrb[4].mxu0 }
 0x116   :  { %v680_v7 = vpop.f32.mrb[5].mxu0 }
 0x117   :  { %v681_v8 = vadd.f32 %v680_v7, %v679_v6  ;;  %v682_v9 = vpop.f32.mrb[6].mxu0 }
 0x118   :  { %v683_v10 = vpop.f32.mrb[7].mxu0 }
 0x119   :  { %v545_v11 = vadd.f32 %v681_v8, %v505_v5 }
 0x11b   :  { %550 = vmax.xlane.f32.xlu0 %v545_v11 }
 0x1a8   :  { %v551_v12 = vpop.xlane.xlu0 %550 }
 0x1a9   :  { %v552_v13 = vsub.f32 %v545_v11, %v551_v12 }
 0x1ab   :  { %v553_v14 = vmul.f32 1.442695, %v552_v13 }
 0x1ad   :  { %739 = vpow2.f32 %v553_v14 }
 0x1b7   :  { %v740_v15 = vpop.eup %739 }
 0x1b8   :  { %555 = vadd.xlane.f32.xlu0 %v740_v15 }
 0x245   :  { %v556_v16 = vpop.xlane.xlu0 %555 }
 0x246   :  { %741 = vrcp.f32 %v556_v16 }
 0x250   :  { %v742_v17 = vpop.eup %741 }
 0x251   :  { %v558_v18 = vmul.f32 %v742_v17, %v740_v15 }
 0x253   :  { %559 = vst [vmem:[%s925_s3] sm:$0xff] %v558_v18 }

</bundles_post_ra>
